<compile_context>
chip_gen: v5e
topology: v5e:2x2
jax: 0.10.0
libtpu: 0.0.40
codegen_flags: <defaults>
</compile_context>

<pallas_src>
import functools
import math

import jax
import jax.numpy as jnp
from jax.experimental import pallas as pl
from jax.experimental.pallas import tpu as pltpu


def _round_up(x, m):
    return (x + m - 1) // m * m


# --------------------------------------------------------------------------
# Fused multi-layer MLP kernel: the whole stack of Linear(+ReLU) in one call.
# refs = (x_ref, w0, b0, w1, b1, ..., w_{L-1}, b_{L-1}, out_ref)
# x_ref: (TILE_N, D0) tile; w_i: (Di, Di+1_pad); b_i: (1, Di+1_pad)
# --------------------------------------------------------------------------
def _fused_mlp_kernel(*refs, num_layers, first_fma_k):
    x_ref, o_ref = refs[0], refs[-1]
    h = x_ref[...]
    for i in range(num_layers):
        w = refs[1 + 2 * i][...]
        b = refs[2 + 2 * i][...].astype(jnp.float32)        # (1, D) — broadcasts
        if i == 0 and first_fma_k:
            # Tiny-K first layer (ref_point_head, K=2): unrolled broadcast FMAs
            # on the VPU instead of an almost-empty MXU pass.
            hf = h.astype(jnp.float32)
            wf = w.astype(jnp.float32)
            acc = hf[:, 0:1] * wf[0:1, :]
            for k in range(1, first_fma_k):
                acc = acc + hf[:, k:k + 1] * wf[k:k + 1, :]
            h = acc + b
        else:
            if h.dtype != w.dtype:                           # bf16 path: bf16 x bf16 MXU
                h = h.astype(w.dtype)
            h = jnp.dot(h, w, preferred_element_type=jnp.float32) + b
        if i < num_layers - 1:                               # ReLU between layers only
            h = jnp.maximum(h, 0.0)
    o_ref[...] = h.astype(o_ref.dtype)


# --------------------------------------------------------------------------
# MLP params: torch.nn.Linear-style init (U(-1/sqrt(fan_in), 1/sqrt(fan_in))),
# weights stored (in, out).  Hidden/output dims are zero-padded to multiples
# of 128 (lane-dense MXU tiles); the raw input dim of layer 0 is left
# unpadded (kernel uses it directly).  Zero-padded rows / bias lanes keep the
# math bit-exact w.r.t. the unpadded layers.
# --------------------------------------------------------------------------
def init_mlp_params(key, input_dim, hidden_dim, output_dim, num_layers,
                    dtype=jnp.float32):
    h = [hidden_dim] * (num_layers - 1)
    dims = [input_dim] + h + [output_dim]
    pdims = [dims[0]] + [_round_up(max(d, 1), 128) for d in dims[1:]]
    layers = []
    for i in range(num_layers):
        key, wk, bk = jax.random.split(key, 3)
        bound = 1.0 / math.sqrt(dims[i])
        w = jax.random.uniform(wk, (dims[i], dims[i + 1]), jnp.float32, -bound, bound)
        b = jax.random.uniform(bk, (dims[i + 1],), jnp.float32, -bound, bound)
        wp = jnp.zeros((pdims[i], pdims[i + 1]), jnp.float32)
        wp = wp.at[:dims[i], :dims[i + 1]].set(w).astype(dtype)
        bp = jnp.zeros((1, pdims[i + 1]), jnp.float32)
        bp = bp.at[0, :dims[i + 1]].set(b).astype(dtype)
        layers.append((wp, bp))
    return {"layers": layers, "dims": dims, "pdims": pdims}


def mlp_forward(x, mlp, *, tile_n_max=512):
    """x: (..., input_dim) -> (..., output_dim); whole MLP in ONE pallas_call."""
    layers = mlp["layers"]
    dims, pdims = mlp["dims"], mlp["pdims"]
    num_layers = len(layers)
    lead = x.shape[:-1]

    n = 1
    for s in lead:
        n *= int(s)
    d_in, d_out = dims[0], dims[-1]
    d_out_pad = pdims[-1]
    w_dtype = layers[0][0].dtype
    sub = 16 if w_dtype == jnp.bfloat16 else 8               # sublane alignment

    x2 = x.reshape(n, d_in)                                   # no host-side N/D padding

    # Token tiling: target >= 2 grid steps (both v7x TCs work), cap at
    # tile_n_max.  Last tile may be ragged — Pallas masks the partial write.
    tile_n = min(tile_n_max, _round_up(pl.cdiv(n, 2), sub))
    tile_n = max(tile_n, sub)
    if tile_n >= n:
        tile_n = n                                            # single full-extent block
    grid = (pl.cdiv(n, tile_n),)

    # Tiny-K first layer -> in-kernel VPU FMAs instead of MXU matmul.
    first_fma_k = d_in if d_in < 8 else 0

    flat_wb = [a for wb in layers for a in wb]

    def build_specs(single_buffer_weights):
        def resident(shape):
            # Full-array block + constant index_map -> fetched once, resident
            # in VMEM across the grid; Buffered(1) drops the useless second
            # pipeline buffer (halves resident-weight VMEM).
            if single_buffer_weights:
                try:
                    return pl.BlockSpec(shape, lambda i: (0, 0),
                                        pipeline_mode=pl.Buffered(1))
                except TypeError:
                    pass
            return pl.BlockSpec(shape, lambda i: (0, 0))
        in_specs = [pl.BlockSpec((tile_n, d_in), lambda i: (i, 0))]
        for w, b in layers:
            in_specs.append(resident(w.shape))
            in_specs.append(resident(b.shape))
        out_specs = pl.BlockSpec((tile_n, d_out_pad), lambda i: (i, 0))
        return in_specs, out_specs

    # Exact, generation-aware VMEM budget: 2x activation tiles (double
    # buffered), 1x resident weights, live f32 intermediates, + slack.
    d_mid_max = max(pdims[1:])
    req = (2 * tile_n * d_in * x.dtype.itemsize
           + 2 * tile_n * d_out_pad * x.dtype.itemsize
           + sum(int(a.size) * a.dtype.itemsize for a in flat_wb)
           + 2 * tile_n * d_mid_max * 4
           + (2 << 20))
    try:
        cap = int(0.75 * pltpu.get_tpu_info().vmem_capacity_bytes)
    except Exception:
        cap = 48 << 20                                        # 0.75 * v7x's 64 MiB
    vmem_limit = int(max(req, min(max(2 * req, 8 << 20), cap)))

    def run(single_buffer_weights):
        in_specs, out_specs = build_specs(single_buffer_weights)
        return pl.pallas_call(
            functools.partial(_fused_mlp_kernel, num_layers=num_layers,
                              first_fma_k=first_fma_k),
            out_shape=jax.ShapeDtypeStruct((n, d_out_pad), x.dtype),
            grid=grid,
            in_specs=in_specs,
            out_specs=out_specs,
            compiler_params=pltpu.CompilerParams(
                dimension_semantics=("parallel",),            # 2 TCs on v7x
                vmem_limit_bytes=vmem_limit,
            ),
        )(x2, *flat_wb)

    try:
        out = run(True)
    except Exception:
        # Fallback if this jax build rejects Buffered(1) in the main pipeline.
        out = run(False)

    if d_out_pad != d_out:
        out = out[:, :d_out]
    return out.reshape(*lead, d_out)


# --------------------------------------------------------------------------
# DeformableTransformerDecoder
# --------------------------------------------------------------------------
def init_decoder_params(key, d_model, num_layers, dtype=jnp.float32):
    k1, k2 = jax.random.split(key)
    return {
        "num_layers": num_layers,
        "d_model": d_model,
        # query_scale: MLP(d_model, d_model, d_model, 2).  With the torch
        # module's `if query_pos is None` guard it is only reachable while
        # query_pos is still None past lid 0 (dead in the standard flow) —
        # kept for parity with the torch module.
        "query_scale": init_mlp_params(k1, d_model, d_model, d_model, 2, dtype),
        # ref_point_head: MLP(2, d_model, d_model, 3)
        "ref_point_head": init_mlp_params(k2, 2, d_model, d_model, 3, dtype),
        "bbox_embed": None,        # default None in the torch module
        "class_embed": None,
    }


def _decoder_layer_forward(lid, output, query_pos, reference_points_input,
                           src, src_pos, src_spatial_shapes,
                           src_level_start_index):
    # TODO(synk): DeformableTransformerDecoderLayer (self-attn + deformable
    # cross-attn + FFN + norms) is an injected constructor dependency not
    # defined in the spec; left as a pass-through.
    return output


def decoder_forward(params, tgt, reference_points, src, src_pos,
                    src_spatial_shapes, src_level_start_index,
                    query_pos=None, return_intermediate=False):
    """Mirrors DeformableTransformerDecoder.forward (bbox_embed is None)."""
    output = tgt
    intermediate = []
    intermediate_reference_points = []
    for lid in range(params["num_layers"]):
        reference_points_input = reference_points[:, :, None]
        if query_pos is None:
            raw_query_pos = mlp_forward(reference_points_input[:, :, 0, :],
                                        params["ref_point_head"])
            if lid != 0:
                pos_scale = mlp_forward(output, params["query_scale"])
                query_pos = pos_scale * raw_query_pos
            else:
                query_pos = raw_query_pos          # pos_scale == 1 -> skip multiply
        output = _decoder_layer_forward(lid, output, query_pos,
                                        reference_points_input, src, src_pos,
                                        src_spatial_shapes,
                                        src_level_start_index)
        # bbox_embed is None -> no iterative reference-point refinement branch.
        if return_intermediate:
            intermediate.append(output)
            intermediate_reference_points.append(reference_points)
    if return_intermediate:
        return (jnp.stack(intermediate),
                jnp.stack(intermediate_reference_points))
    return (output, reference_points)


# --------------------------------------------------------------------------
# Pure-JAX references (no Pallas) for correctness checks.
# --------------------------------------------------------------------------
def _mlp_ref(x, mlp):
    dims = mlp["dims"]
    num_layers = len(mlp["layers"])
    h = x
    for i, (wp, bp) in enumerate(mlp["layers"]):
        w = wp[:dims[i], :dims[i + 1]].astype(jnp.float32)
        b = bp[0, :dims[i + 1]].astype(jnp.float32)
        h = h @ w + b
        if i < num_layers - 1:
            h = jnp.maximum(h, 0.0)
    return h


def _decoder_ref(params, tgt, reference_points, query_pos=None,
                 return_intermediate=False):
    output = tgt
    inter, inter_ref = [], []
    for lid in range(params["num_layers"]):
        if query_pos is None:
            raw = _mlp_ref(reference_points, params["ref_point_head"])
            if lid != 0:
                query_pos = _mlp_ref(output, params["query_scale"]) * raw
            else:
                query_pos = raw
        # identity decoder layer (same placeholder as the Pallas path)
        if return_intermediate:
            inter.append(output)
            inter_ref.append(reference_points)
    if return_intermediate:
        return jnp.stack(inter), jnp.stack(inter_ref)
    return output, reference_points


if __name__ == "__main__":
    key = jax.random.PRNGKey(0)
    k_tgt, k_ref, k_src, k_pos, k_par = jax.random.split(key, 5)

    bs, nq, d_model = 2, 8, 128
    num_dec_layers, T = 2, 32

    tgt = jax.random.normal(k_tgt, (bs, nq, d_model), jnp.float32)
    reference_points = jax.nn.sigmoid(
        jax.random.normal(k_ref, (bs, nq, 2), jnp.float32))
    src = jax.random.normal(k_src, (bs, T, d_model), jnp.float32)
    src_pos = jax.random.normal(k_pos, (bs, T, d_model), jnp.float32)
    src_spatial_shapes = jnp.array([[T]], jnp.int32)
    src_level_start_index = jnp.array([0], jnp.int32)

    params = init_decoder_params(k_par, d_model, num_dec_layers)

    out, ref_pts = decoder_forward(params, tgt, reference_points, src, src_pos,
                                   src_spatial_shapes, src_level_start_index,
                                   query_pos=None, return_intermediate=True)
    out = jax.block_until_ready(out)
    ref_pts = jax.block_until_ready(ref_pts)

    # Decoder-level check (shapes + loop/stacking semantics).
    out_ref, refpts_ref = _decoder_ref(params, tgt, reference_points,
                                       query_pos=None, return_intermediate=True)
    assert out.shape == (num_dec_layers, bs, nq, d_model)
    assert ref_pts.shape == (num_dec_layers, bs, nq, 2)
    assert jnp.allclose(out, out_ref, atol=1e-4, rtol=1e-4)
    assert jnp.allclose(ref_pts, refpts_ref, atol=1e-6, rtol=1e-6)

    # Direct checks of the fused Pallas MLP kernels against the JAX reference.
    qp = jax.block_until_ready(mlp_forward(reference_points,
                                           params["ref_point_head"]))
    qp_ref = _mlp_ref(reference_points, params["ref_point_head"])
    assert jnp.allclose(qp, qp_ref, atol=1e-4, rtol=1e-4)

    qs = jax.block_until_ready(mlp_forward(tgt, params["query_scale"]))
    qs_ref = _mlp_ref(tgt, params["query_scale"])
    assert jnp.allclose(qs, qs_ref, atol=1e-4, rtol=1e-4)

    print("KERNEL_OK")
</pallas_src>

<mosaic_0001>
module attributes {stable_mosaic.version = 11 : i64} {
  func.func @_fused_mlp_kernel(%arg0: i32, %arg1: memref<8x2xf32, #tpu.memory_space<vmem>>, %arg2: memref<2x128xf32, #tpu.memory_space<vmem>>, %arg3: memref<1x128xf32, #tpu.memory_space<vmem>>, %arg4: memref<128x128xf32, #tpu.memory_space<vmem>>, %arg5: memref<1x128xf32, #tpu.memory_space<vmem>>, %arg6: memref<128x128xf32, #tpu.memory_space<vmem>>, %arg7: memref<1x128xf32, #tpu.memory_space<vmem>>, %arg8: memref<8x128xf32, #tpu.memory_space<vmem>>) attributes {dimension_semantics = [#tpu.dimension_semantics<parallel>], iteration_bounds = array<i64: 2>, scalar_prefetch = 0 : i64, scratch_operands = 0 : i64, tpu.core_type = #tpu.core_type<tc>, window_params = [{transform_indices = @transform_0, window_bounds = array<i64: 8, 2>}, {pipeline_mode = #tpu.pipeline_mode<synchronous>, transform_indices = @transform_1, window_bounds = array<i64: 2, 128>}, {pipeline_mode = #tpu.pipeline_mode<synchronous>, transform_indices = @transform_2, window_bounds = array<i64: 1, 128>}, {pipeline_mode = #tpu.pipeline_mode<synchronous>, transform_indices = @transform_3, window_bounds = array<i64: 128, 128>}, {pipeline_mode = #tpu.pipeline_mode<synchronous>, transform_indices = @transform_4, window_bounds = array<i64: 1, 128>}, {pipeline_mode = #tpu.pipeline_mode<synchronous>, transform_indices = @transform_5, window_bounds = array<i64: 128, 128>}, {pipeline_mode = #tpu.pipeline_mode<synchronous>, transform_indices = @transform_6, window_bounds = array<i64: 1, 128>}, {transform_indices = @transform_7, window_bounds = array<i64: 8, 128>}]} {
    %c0 = arith.constant 0 : index
    %c0_0 = arith.constant 0 : index
    %0 = vector.load %arg1[%c0, %c0_0] : memref<8x2xf32, #tpu.memory_space<vmem>>, vector<8x2xf32>
    %c0_1 = arith.constant 0 : index
    %c0_2 = arith.constant 0 : index
    %1 = vector.load %arg2[%c0_1, %c0_2] : memref<2x128xf32, #tpu.memory_space<vmem>>, vector<2x128xf32>
    %c0_3 = arith.constant 0 : index
    %c0_4 = arith.constant 0 : index
    %2 = vector.load %arg3[%c0_3, %c0_4] : memref<1x128xf32, #tpu.memory_space<vmem>>, vector<1x128xf32>
    %3 = vector.extract_strided_slice %0 {offsets = [0, 0], sizes = [8, 1], strides = [1, 1]} : vector<8x2xf32> to vector<8x1xf32>
    %4 = vector.extract_strided_slice %1 {offsets = [0, 0], sizes = [1, 128], strides = [1, 1]} : vector<2x128xf32> to vector<1x128xf32>
    %5 = vector.broadcast %3 : vector<8x1xf32> to vector<8x128xf32>
    %6 = vector.broadcast %4 : vector<1x128xf32> to vector<8x128xf32>
    %7 = arith.mulf %5, %6 : vector<8x128xf32>
    %8 = vector.extract_strided_slice %0 {offsets = [0, 1], sizes = [8, 1], strides = [1, 1]} : vector<8x2xf32> to vector<8x1xf32>
    %9 = vector.extract_strided_slice %1 {offsets = [1, 0], sizes = [1, 128], strides = [1, 1]} : vector<2x128xf32> to vector<1x128xf32>
    %10 = vector.broadcast %8 : vector<8x1xf32> to vector<8x128xf32>
    %11 = vector.broadcast %9 : vector<1x128xf32> to vector<8x128xf32>
    %12 = arith.mulf %10, %11 : vector<8x128xf32>
    %13 = arith.addf %7, %12 : vector<8x128xf32>
    %14 = vector.broadcast %2 : vector<1x128xf32> to vector<8x128xf32>
    %15 = arith.addf %13, %14 : vector<8x128xf32>
    %cst = arith.constant 0.000000e+00 : f32
    %16 = vector.broadcast %cst : f32 to vector<8x128xf32>
    %17 = arith.maximumf %15, %16 : vector<8x128xf32>
    %c0_5 = arith.constant 0 : index
    %c0_6 = arith.constant 0 : index
    %18 = vector.load %arg4[%c0_5, %c0_6] : memref<128x128xf32, #tpu.memory_space<vmem>>, vector<128x128xf32>
    %c0_7 = arith.constant 0 : index
    %c0_8 = arith.constant 0 : index
    %19 = vector.load %arg5[%c0_7, %c0_8] : memref<1x128xf32, #tpu.memory_space<vmem>>, vector<1x128xf32>
    %cst_9 = arith.constant dense<0.000000e+00> : vector<8x128xf32>
    %20 = tpu.matmul %17, %18, %cst_9 {dimension_numbers = #tpu.dot_dimension_numbers<[1], [0], [0], [1], [0, 0, 1, 1], [], []>} : vector<8x128xf32>, vector<128x128xf32>, vector<8x128xf32> -> vector<8x128xf32>
    %21 = vector.broadcast %19 : vector<1x128xf32> to vector<8x128xf32>
    %22 = arith.addf %20, %21 : vector<8x128xf32>
    %cst_10 = arith.constant 0.000000e+00 : f32
    %23 = vector.broadcast %cst_10 : f32 to vector<8x128xf32>
    %24 = arith.maximumf %22, %23 : vector<8x128xf32>
    %c0_11 = arith.constant 0 : index
    %c0_12 = arith.constant 0 : index
    %25 = vector.load %arg6[%c0_11, %c0_12] : memref<128x128xf32, #tpu.memory_space<vmem>>, vector<128x128xf32>
    %c0_13 = arith.constant 0 : index
    %c0_14 = arith.constant 0 : index
    %26 = vector.load %arg7[%c0_13, %c0_14] : memref<1x128xf32, #tpu.memory_space<vmem>>, vector<1x128xf32>
    %cst_15 = arith.constant dense<0.000000e+00> : vector<8x128xf32>
    %27 = tpu.matmul %24, %25, %cst_15 {dimension_numbers = #tpu.dot_dimension_numbers<[1], [0], [0], [1], [0, 0, 1, 1], [], []>} : vector<8x128xf32>, vector<128x128xf32>, vector<8x128xf32> -> vector<8x128xf32>
    %28 = vector.broadcast %26 : vector<1x128xf32> to vector<8x128xf32>
    %29 = arith.addf %27, %28 : vector<8x128xf32>
    %c0_16 = arith.constant 0 : index
    %c0_17 = arith.constant 0 : index
    %30 = vector.load %arg8[%c0_16, %c0_17] : memref<8x128xf32, #tpu.memory_space<vmem>>, vector<8x128xf32>
    tpu.vector_store %arg8[%c0_16, %c0_17], %29 {strides = array<i32>} : memref<8x128xf32, #tpu.memory_space<vmem>>, vector<8x128xf32>,
    return
  }
  func.func @transform_0(%arg0: i32) -> (i32, i32) {
    %c0_i32 = arith.constant 0 : i32
    %c0_i32_0 = arith.constant 0 : i32
    return %arg0, %c0_i32 : i32, i32
  }
  func.func @transform_1(%arg0: i32) -> (i32, i32) {
    %c0_i32 = arith.constant 0 : i32
    %c0_i32_0 = arith.constant 0 : i32
    %c0_i32_1 = arith.constant 0 : i32
    return %c0_i32, %c0_i32_0 : i32, i32
  }
  func.func @transform_2(%arg0: i32) -> (i32, i32) {
    %c0_i32 = arith.constant 0 : i32
    %c0_i32_0 = arith.constant 0 : i32
    %c0_i32_1 = arith.constant 0 : i32
    return %c0_i32, %c0_i32_0 : i32, i32
  }
  func.func @transform_3(%arg0: i32) -> (i32, i32) {
    %c0_i32 = arith.constant 0 : i32
    %c0_i32_0 = arith.constant 0 : i32
    %c0_i32_1 = arith.constant 0 : i32
    return %c0_i32, %c0_i32_0 : i32, i32
  }
  func.func @transform_4(%arg0: i32) -> (i32, i32) {
    %c0_i32 = arith.constant 0 : i32
    %c0_i32_0 = arith.constant 0 : i32
    %c0_i32_1 = arith.constant 0 : i32
    return %c0_i32, %c0_i32_0 : i32, i32
  }
  func.func @transform_5(%arg0: i32) -> (i32, i32) {
    %c0_i32 = arith.constant 0 : i32
    %c0_i32_0 = arith.constant 0 : i32
    %c0_i32_1 = arith.constant 0 : i32
    return %c0_i32, %c0_i32_0 : i32, i32
  }
  func.func @transform_6(%arg0: i32) -> (i32, i32) {
    %c0_i32 = arith.constant 0 : i32
    %c0_i32_0 = arith.constant 0 : i32
    %c0_i32_1 = arith.constant 0 : i32
    return %c0_i32, %c0_i32_0 : i32, i32
  }
  func.func @transform_7(%arg0: i32) -> (i32, i32) {
    %c0_i32 = arith.constant 0 : i32
    %c0_i32_0 = arith.constant 0 : i32
    return %arg0, %c0_i32 : i32, i32
  }
}

module attributes {stable_mosaic.version = 11 : i64} {
  func.func @_fused_mlp_kernel(%arg0: i32, %arg1: memref<8x2xf32, #tpu.memory_space<vmem>>, %arg2: memref<2x128xf32, #tpu.memory_space<vmem>>, %arg3: memref<1x128xf32, #tpu.memory_space<vmem>>, %arg4: memref<128x128xf32, #tpu.memory_space<vmem>>, %arg5: memref<1x128xf32, #tpu.memory_space<vmem>>, %arg6: memref<128x128xf32, #tpu.memory_space<vmem>>, %arg7: memref<1x128xf32, #tpu.memory_space<vmem>>, %arg8: memref<8x128xf32, #tpu.memory_space<vmem>>) attributes {dimension_semantics = [#tpu.dimension_semantics<parallel>], iteration_bounds = array<i64: 2>, scalar_prefetch = 0 : i64, scratch_operands = 0 : i64, tpu.core_type = #tpu.core_type<tc>, window_params = [{transform_indices = @transform_0, window_bounds = array<i64: 8, 2>}, {pipeline_mode = #tpu.pipeline_mode<synchronous>, transform_indices = @transform_1, window_bounds = array<i64: 2, 128>}, {pipeline_mode = #tpu.pipeline_mode<synchronous>, transform_indices = @transform_2, window_bounds = array<i64: 1, 128>}, {pipeline_mode = #tpu.pipeline_mode<synchronous>, transform_indices = @transform_3, window_bounds = array<i64: 128, 128>}, {pipeline_mode = #tpu.pipeline_mode<synchronous>, transform_indices = @transform_4, window_bounds = array<i64: 1, 128>}, {pipeline_mode = #tpu.pipeline_mode<synchronous>, transform_indices = @transform_5, window_bounds = array<i64: 128, 128>}, {pipeline_mode = #tpu.pipeline_mode<synchronous>, transform_indices = @transform_6, window_bounds = array<i64: 1, 128>}, {transform_indices = @transform_7, window_bounds = array<i64: 8, 128>}]} {
    %c0 = arith.constant 0 : index
    %c0_0 = arith.constant 0 : index
    %0 = vector.load %arg1[%c0, %c0_0] : memref<8x2xf32, #tpu.memory_space<vmem>>, vector<8x2xf32>
    %c0_1 = arith.constant 0 : index
    %c0_2 = arith.constant 0 : index
    %1 = vector.load %arg2[%c0_1, %c0_2] : memref<2x128xf32, #tpu.memory_space<vmem>>, vector<2x128xf32>
    %c0_3 = arith.constant 0 : index
    %c0_4 = arith.constant 0 : index
    %2 = vector.load %arg3[%c0_3, %c0_4] : memref<1x128xf32, #tpu.memory_space<vmem>>, vector<1x128xf32>
    %3 = vector.extract_strided_slice %0 {offsets = [0, 0], sizes = [8, 1], strides = [1, 1]} : vector<8x2xf32> to vector<8x1xf32>
    %4 = vector.extract_strided_slice %1 {offsets = [0, 0], sizes = [1, 128], strides = [1, 1]} : vector<2x128xf32> to vector<1x128xf32>
    %5 = vector.broadcast %3 : vector<8x1xf32> to vector<8x128xf32>
    %6 = vector.broadcast %4 : vector<1x128xf32> to vector<8x128xf32>
    %7 = arith.mulf %5, %6 : vector<8x128xf32>
    %8 = vector.extract_strided_slice %0 {offsets = [0, 1], sizes = [8, 1], strides = [1, 1]} : vector<8x2xf32> to vector<8x1xf32>
    %9 = vector.extract_strided_slice %1 {offsets = [1, 0], sizes = [1, 128], strides = [1, 1]} : vector<2x128xf32> to vector<1x128xf32>
    %10 = vector.broadcast %8 : vector<8x1xf32> to vector<8x128xf32>
    %11 = vector.broadcast %9 : vector<1x128xf32> to vector<8x128xf32>
    %12 = arith.mulf %10, %11 : vector<8x128xf32>
    %13 = arith.addf %7, %12 : vector<8x128xf32>
    %14 = vector.broadcast %2 : vector<1x128xf32> to vector<8x128xf32>
    %15 = arith.addf %13, %14 : vector<8x128xf32>
    %cst = arith.constant 0.000000e+00 : f32
    %16 = vector.broadcast %cst : f32 to vector<8x128xf32>
    %17 = arith.maximumf %15, %16 : vector<8x128xf32>
    %c0_5 = arith.constant 0 : index
    %c0_6 = arith.constant 0 : index
    %18 = vector.load %arg4[%c0_5, %c0_6] : memref<128x128xf32, #tpu.memory_space<vmem>>, vector<128x128xf32>
    %c0_7 = arith.constant 0 : index
    %c0_8 = arith.constant 0 : index
    %19 = vector.load %arg5[%c0_7, %c0_8] : memref<1x128xf32, #tpu.memory_space<vmem>>, vector<1x128xf32>
    %cst_9 = arith.constant dense<0.000000e+00> : vector<8x128xf32>
    %20 = tpu.matmul %17, %18, %cst_9 {dimension_numbers = #tpu.dot_dimension_numbers<[1], [0], [0], [1], [0, 0, 1, 1], [], []>} : vector<8x128xf32>, vector<128x128xf32>, vector<8x128xf32> -> vector<8x128xf32>
    %21 = vector.broadcast %19 : vector<1x128xf32> to vector<8x128xf32>
    %22 = arith.addf %20, %21 : vector<8x128xf32>
    %cst_10 = arith.constant 0.000000e+00 : f32
    %23 = vector.broadcast %cst_10 : f32 to vector<8x128xf32>
    %24 = arith.maximumf %22, %23 : vector<8x128xf32>
    %c0_11 = arith.constant 0 : index
    %c0_12 = arith.constant 0 : index
    %25 = vector.load %arg6[%c0_11, %c0_12] : memref<128x128xf32, #tpu.memory_space<vmem>>, vector<128x128xf32>
    %c0_13 = arith.constant 0 : index
    %c0_14 = arith.constant 0 : index
    %26 = vector.load %arg7[%c0_13, %c0_14] : memref<1x128xf32, #tpu.memory_space<vmem>>, vector<1x128xf32>
    %cst_15 = arith.constant dense<0.000000e+00> : vector<8x128xf32>
    %27 = tpu.matmul %24, %25, %cst_15 {dimension_numbers = #tpu.dot_dimension_numbers<[1], [0], [0], [1], [0, 0, 1, 1], [], []>} : vector<8x128xf32>, vector<128x128xf32>, vector<8x128xf32> -> vector<8x128xf32>
    %28 = vector.broadcast %26 : vector<1x128xf32> to vector<8x128xf32>
    %29 = arith.addf %27, %28 : vector<8x128xf32>
    %c0_16 = arith.constant 0 : index
    %c0_17 = arith.constant 0 : index
    %30 = vector.load %arg8[%c0_16, %c0_17] : memref<8x128xf32, #tpu.memory_space<vmem>>, vector<8x128xf32>
    tpu.vector_store %arg8[%c0_16, %c0_17], %29 {strides = array<i32>} : memref<8x128xf32, #tpu.memory_space<vmem>>, vector<8x128xf32>,
    return
  }
  func.func @transform_0(%arg0: i32) -> (i32, i32) {
    %c0_i32 = arith.constant 0 : i32
    %c0_i32_0 = arith.constant 0 : i32
    return %arg0, %c0_i32 : i32, i32
  }
  func.func @transform_1(%arg0: i32) -> (i32, i32) {
    %c0_i32 = arith.constant 0 : i32
    %c0_i32_0 = arith.constant 0 : i32
    %c0_i32_1 = arith.constant 0 : i32
    return %c0_i32, %c0_i32_0 : i32, i32
  }
  func.func @transform_2(%arg0: i32) -> (i32, i32) {
    %c0_i32 = arith.constant 0 : i32
    %c0_i32_0 = arith.constant 0 : i32
    %c0_i32_1 = arith.constant 0 : i32
    return %c0_i32, %c0_i32_0 : i32, i32
  }
  func.func @transform_3(%arg0: i32) -> (i32, i32) {
    %c0_i32 = arith.constant 0 : i32
    %c0_i32_0 = arith.constant 0 : i32
    %c0_i32_1 = arith.constant 0 : i32
    return %c0_i32, %c0_i32_0 : i32, i32
  }
  func.func @transform_4(%arg0: i32) -> (i32, i32) {
    %c0_i32 = arith.constant 0 : i32
    %c0_i32_0 = arith.constant 0 : i32
    %c0_i32_1 = arith.constant 0 : i32
    return %c0_i32, %c0_i32_0 : i32, i32
  }
  func.func @transform_5(%arg0: i32) -> (i32, i32) {
    %c0_i32 = arith.constant 0 : i32
    %c0_i32_0 = arith.constant 0 : i32
    %c0_i32_1 = arith.constant 0 : i32
    return %c0_i32, %c0_i32_0 : i32, i32
  }
  func.func @transform_6(%arg0: i32) -> (i32, i32) {
    %c0_i32 = arith.constant 0 : i32
    %c0_i32_0 = arith.constant 0 : i32
    %c0_i32_1 = arith.constant 0 : i32
    return %c0_i32, %c0_i32_0 : i32, i32
  }
  func.func @transform_7(%arg0: i32) -> (i32, i32) {
    %c0_i32 = arith.constant 0 : i32
    %c0_i32_0 = arith.constant 0 : i32
    return %arg0, %c0_i32 : i32, i32
  }
}

</mosaic_0001>

<bundles_post_ra>
// kernel: tpu_custom_call.1
= control target key start
LH: loop header
LB: loop body
LE: loop exit
PB: predicated region body
PF: predicated region fallthrough
CT: control target
= control target key end

     0   :  { %12 = vsyncpa [#allocation3], 0  ;;  %s892_s0 = inlined_call_operand.vmem [shape: f32[16,2], index: 0, kind: input, shape index: {}]   ;;  %s893_s1 = inlined_call_operand.vmem [shape: f32[2,128], index: 1, kind: input, shape index: {}]   ;;  %s894_s2 = inlined_call_operand.vmem [shape: f32[1,128], index: 2, kind: input, shape index: {}]   ;;  %s895_s3 = inlined_call_operand.hbm [shape: f32[128,128], index: 3, kind: input, shape index: {}]   ;;  %s896_s4 = inlined_call_operand.vmem [shape: f32[1,128], index: 4, kind: input, shape index: {}]   ;;  %s897_s5 = inlined_call_operand.hbm [shape: f32[128,128], index: 5, kind: input, shape index: {}]   ;;  %s898_s6 = inlined_call_operand.vmem [shape: f32[1,128], index: 6, kind: input, shape index: {}]   ;;  %s899_s7 = inlined_call_operand.hbm [shape: f32[16,128], index: 7, kind: output, shape index: {}]  }
   0x1   :  { %13 = vsyncpa [#allocation6], 0 }
   0x2   :  { %14 = vsyncpa [#allocation4], 0 }
   0x3   :  { %16 = vsyncpa [#allocation4 + $0x1], 0  ;;  %s770_s24 = smov 0   ;;  %s772_s25 = smov 0  }
   0x4   :  { %s774_s26 = smov 0   ;;  %s776_s27 = smov 0  }
   0x5 LB: > { %s791_s28 = sadd.s32 4294967295, %s722_s27   ;;  %s509_s29 = sadd.s32 4294967294, %s722_s27   ;;  %s722_s27 = sphi %s776_s27, %s906_s27   ;;  %s718_s26 = sphi %s774_s26, %s905_s26   ;;  %s714_s25 = sphi %s772_s25, %s904_s25   ;;  %s710_s24 = sphi %s770_s24, %s903_s24  }
   0x6   : > { %s795_s30 = sadd.s32 1, %s722_s27   ;;  %s181_s8 = sadd.s32 1, %s718_s26 }
   0x7   : > { %s178_s9 = ssub.s32 %s722_s27, %s795_s30  ;;  %p191_p0 = scmp.ne.s32.totalorder %s718_s26, %s714_s25 }
   0x8   : > { %p179_p1 = scmp.eq.s32.totalorder %s178_s9, 0  ;;  %p192_p2 = scmp.eq.s32.totalorder %s791_s28, 1 }
   0x9   : > { %p197_p3 = scmp.ne.s32.totalorder %s714_s25, %s710_s24  ;;  %p198_p4 = scmp.eq.s32.totalorder %s509_s29, 1 }
   0xa   : > { %s806_s10 = scalar_select %p179_p1, %s718_s26, %s181_s8  }
   0xb   : > { %p808_p5 = por %p192_p2, %p191_p0  ;;  %p812_p6 = por %p198_p4, %p197_p3 }
   0xc   : > { %p510_p7 = scmp.ge.s32.totalorder %s722_s27, 1  ;;  %p205_p8 = scmp.lt.s32.totalorder %s722_s27, 3 }
   0xd   : > { %p544_p9 = scmp.eq.s32.totalorder %s791_s28, 0  ;;  %s222_s16 = sshll.u32 %s895_s3, 4  ;;  %s223_s16 = int_to_ptr.hbm [resolvable:$true] %s222_s16 }
   0xe   : > { %p819_p10 = pnand %p510_p7, %p205_p8  ;;  %s724_s17 = smov [#allocation2]  }
   0xf   : > { %s224_s18 = sshll.u32 %s724_s17, 4  ;;  %s239_s21 = sshll.u32 %s897_s5, 4  ;;  %s225_s18 = int_to_ptr.vmem [resolvable:$true] %s224_s18  ;;  %s240_s21 = int_to_ptr.hbm [resolvable:$true] %s239_s21 }
  0x10   : > { %p533_p11 = pneg %p819_p10  ;;  %s725_s22 = smov 128  }
  0x11   : > { %s726_s23 = smov 8   ;;  %s727_s29 = smov [#allocation5]  }
  0x12   : > { %p534_p12 = pnand %p544_p9, %p533_p11  ;;  %s241_s8 = sshll.u32 %s727_s29, 4  ;;  %s242_s8 = int_to_ptr.vmem [resolvable:$true] %s241_s8 }
  0x13   : > { %267 = sbr.rel (%p819_p10) target bundleno = 427 (0x1ab), region = 48 }
  0x14   : > { %536 = dma.hbm_to_vmem [thread:$0]  (!%p534_p12), %s223_s16, 2048, %s225_s18, [#allocation3], %s725_s22, %s725_s22, %s726_s23  }
  0x15   : > { %539 = dma.hbm_to_vmem [thread:$0]  (!%p534_p12), %s240_s21, 2048, %s242_s8, [#allocation6], %s725_s22, %s725_s22, %s726_s23  }
  0x18   : > { %697 = dma.done.wait (%p544_p9), [#allocation3], 2048  }
  0x19   : > { %699 = vsyncadd (%p544_p9), [#allocation3], 4294965248 }
  0x1a   : > { %701 = dma.done.wait (%p544_p9), [#allocation6], 2048  }
  0x1b   : > { %703 = vsyncadd (%p544_p9), [#allocation6], 4294965248  ;;  %p304_p13 = scmp.lt.s32.totalorder %s791_s28, 1  ;;  %v728_v0 = vmov 0   ;;  %v345_v2 = vld [vmem:[#allocation2 + $0x78] sm:$0xff]  ;;  %v344_v3 = vld [vmem:[#allocation2 + $0x70] sm:$0xff] }
  0x1c   : > { %587 = vset.pattern.permute.xlu0 %v728_v0  ;;  %350 = vmatpush.msra.mxu0 %v345_v2  ;;  %v343_v4 = vld [vmem:[#allocation2 + $0x68] sm:$0xff]  ;;  %v342_v5 = vld [vmem:[#allocation2 + $0x60] sm:$0xff]  ;;  %v341_v6 = vld [vmem:[#allocation2 + $0x58] sm:$0xff]  ;;  %v729_v8 = vmov 1   ;;  %s301_s23 = sand.u32 1, %s714_s25   ;;  %s520_s8 = sshll.u32 %s791_s28, 3 }
  0x1d   : > { %s305_s9 = scalar_select %p304_p13, %s791_s28, 1  ;;  %v340_v7 = vld [vmem:[#allocation2 + $0x50] sm:$0xff]  ;;  %v339_v9 = vld [vmem:[#allocation2 + $0x48] sm:$0xff]  ;;  %v338_v10 = vld [vmem:[#allocation2 + $0x40] sm:$0xff] }
  0x1e   : > { %351 = vmatpush.msra.mxu0 %v344_v3  ;;  %v337_v11 = vld [vmem:[#allocation2 + $0x38] sm:$0xff]  ;;  %v336_v12 = vld [vmem:[#allocation2 + $0x30] sm:$0xff]  ;;  %v335_v13 = vld [vmem:[#allocation2 + $0x28] sm:$0xff]  ;;  %s517_s29 = sshll.u32 %s301_s23, 3  ;;  %s423_s14 = scalar_lea.hbm %s899_s7, %s520_s8 }
  0x1f   : > { %s518_s13 = sshll.u32 %s305_s9, 3  ;;  %v334_v14 = vld [vmem:[#allocation2 + $0x20] sm:$0xff]  ;;  %v333_v15 = vld [vmem:[#allocation2 + $0x18] sm:$0xff]  ;;  %v332_v16 = vld [vmem:[#allocation2 + $0x10] sm:$0xff]  ;;  %s303_s17 = scalar_lea.vmem [#allocation7], %s517_s29 }
  0x20   : > { %s307_s16 = scalar_lea.vmem %s892_s0, %s518_s13  ;;  %352 = vmatpush.msra.mxu0 %v343_v4  ;;  %v331_v17 = vld [vmem:[#allocation2 + $0x8] sm:$0xff]  ;;  %v330_v18 = vld [vmem:[#allocation2] sm:$0xff]  ;;  %v386_v19 = vld [vmem:[#allocation5 + $0x78] sm:$0xff]  ;;  %s425_s18 = sshll.u32 %s303_s17, 4  ;;  %s426_s18 = int_to_ptr.vmem [resolvable:$true] %s425_s18 }
  0x21   : > { %v308_v1 = vld [vmem:[%s307_s16] sm:$0xff]  ;;  %v385_v20 = vld [vmem:[#allocation5 + $0x70] sm:$0xff]  ;;  %391 = vmatpush.msra.mxu1 %v386_v19  ;;  %v384_v21 = vld [vmem:[#allocation5 + $0x68] sm:$0xff]  ;;  %s427_s19 = sshll.u32 %s423_s14, 4  ;;  %s413_s20 = scalar_lea.sflag [#allocation4], %s301_s23  ;;  %s428_s19 = int_to_ptr.hbm [resolvable:$true] %s427_s19 }
  0x22   : > { %313 = vperm.xlu0 %587, %v308_v1   ;;  %353 = vmatpush.msra.mxu0 %v342_v5  ;;  %v383_v22 = vld [vmem:[#allocation5 + $0x60] sm:$0xff]  ;;  %v382_v23 = vld [vmem:[#allocation5 + $0x58] sm:$0xff]  ;;  %v381_v24 = vld [vmem:[#allocation5 + $0x50] sm:$0xff]  ;;  %s666_s21 = sshra.s32 %s428_s19, 4  ;;  %s672_s9 = scalar_lea.hbm %s899_s7, 16  ;;  %s667_s21 = int_to_ptr.hbm [resolvable:$true] %s666_s21 }
  0x23   : > { %392 = vmatpush.msra.mxu1 %v385_v20  ;;  %v380_v25 = vld [vmem:[#allocation5 + $0x48] sm:$0xff]  ;;  %v379_v26 = vld [vmem:[#allocation5 + $0x40] sm:$0xff]  ;;  %v378_v28 = vld [vmem:[#allocation5 + $0x38] sm:$0xff]  ;;  %s668_s28 = scalar_lea.hbm %s667_s21, 8  ;;  %p673_p3 = scmp.lt.s32.totalorder %s667_s21, %s899_s7 }
  0x24   : > { %354 = vmatpush.msra.mxu0 %v341_v6  ;;  %v377_v29 = vld [vmem:[#allocation5 + $0x30] sm:$0xff]  ;;  %v309_v30 = vld [vmem:[%s893_s1] sm:$0x3]  ;;  %v376_v31 = vld [vmem:[#allocation5 + $0x28] sm:$0xff]  ;;  %p669_p0 = scmp.ne.s32.totalorder %s667_s21, %s668_s28  ;;  %p674_p4 = scmp.lt.s32.totalorder %s672_s9, %s668_s28 }
  0x25   : > { %393 = vmatpush.msra.mxu1 %v384_v21  ;;  %v316_v32 = vperm.slane %v309_v30, 0  ;;  %v322_v33 = vperm.slane %v309_v30, 1  ;;  %v375_v34 = vld [vmem:[#allocation5 + $0x20] sm:$0xff]  ;;  %v374_v35 = vld [vmem:[#allocation5 + $0x18] sm:$0xff]  ;;  %v373_v43 = vld [vmem:[#allocation5 + $0x10] sm:$0xff] }
  0x26   : > { %355 = vmatpush.msra.mxu0 %v340_v7  ;;  %v589_v39 = vld [vmem:[%s894_s2] ss:$0 sm:$0xff]  ;;  %v372_v44 = vld [vmem:[#allocation5 + $0x8] sm:$0xff]  ;;  %p670_p1 = pnand %p669_p0, %p808_p5  ;;  %p675_p7 = por %p674_p4, %p673_p3 }
  0x27   : > { %394 = vmatpush.msra.mxu1 %v383_v22  ;;  %v371_v45 = vld [vmem:[#allocation5] sm:$0xff] }
  0x28   : > { %356 = vmatpush.msra.mxu0 %v339_v9  ;;  %v590_v46 = vld [vmem:[%s896_s4] ss:$0 sm:$0xff]  ;;  %p671_p2 = pneg %p670_p1 }
  0x29   : > { %395 = vmatpush.msra.mxu1 %v382_v23  ;;  %v591_v50 = vld [vmem:[%s898_s6] ss:$0 sm:$0xff] }
  0x2a   : > { %588 = vset.pattern.permute.xlu0 %v729_v8  ;;  %357 = vmatpush.msra.mxu0 %v338_v10  ;;  %p676_p8 = pnand %p675_p7, %p671_p2 }
  0x2b   : > { %319 = vperm.xlu0 %588, %v308_v1   ;;  %396 = vmatpush.msra.mxu1 %v381_v24 }
  0x2c   : > { %358 = vmatpush.msra.mxu0 %v337_v11 }
  0x2d   : > { %397 = vmatpush.msra.mxu1 %v380_v25 }
  0x2e   : > { %359 = vmatpush.msra.mxu0 %v336_v12 }
  0x2f   : > { %398 = vmatpush.msra.mxu1 %v379_v26 }
  0x30   : > { %360 = vmatpush.msra.mxu0 %v335_v13 }
  0x31   : > { %399 = vmatpush.msra.mxu1 %v378_v28 }
  0x32   : > { %361 = vmatpush.msra.mxu0 %v334_v14 }
  0x33   : > { %400 = vmatpush.msra.mxu1 %v377_v29 }
  0x34   : > { %362 = vmatpush.msra.mxu0 %v333_v15 }
  0x35   : > { %401 = vmatpush.msra.mxu1 %v376_v31 }
  0x36   : > { %363 = vmatpush.msra.mxu0 %v332_v16 }
  0x37   : > { %402 = vmatpush.msra.mxu1 %v375_v34 }
  0x38   : > { %364 = vmatpush.msra.mxu0 %v331_v17 }
  0x39   : > { %403 = vmatpush.msra.mxu1 %v374_v35 }
  0x3a   : > { %365 = vmatpush.msra.mxu0 %v330_v18 }
  0x3b   : > { %404 = vmatpush.msra.mxu1 %v373_v43 }
  0x3d   : > { %405 = vmatpush.msra.mxu1 %v372_v44 }
  0x3f   : > { %406 = vmatpush.msra.mxu1 %v371_v45 }
  0x94   : > { %v314_v27 = vpop.permute.xlu0 %313 }
  0x95   : > { %v317_v37 = vmul.f32 %v316_v32, %v314_v27 }
  0x9d   : > { %v320_v36 = vpop.permute.xlu0 %319 }
  0x9e   : > { %v323_v38 = vmul.f32 %v322_v33, %v320_v36 }
  0xa0   : > { %v324_v40 = vadd.f32 %v323_v38, %v317_v37 }
  0xa2   : > { %v328_v41 = vadd.f32 %v589_v39, %v324_v40 }
  0xa4   : > { %v329_v42 = vmax.f32 %v328_v41, 0.0 }
  0xa6   : > { %366 = vmatmul.f32.vlgmr.msra.gmra.mxu0 %v329_v42 }
 0x123   : > { %v367_v47 = vpop.f32.mrf.mxu0 }
 0x124   : > { %v368_v48 = vadd.f32 %v590_v46, %v367_v47 }
 0x126   : > { %v370_v49 = vmax.f32 %v368_v48, 0.0 }
 0x128   : > { %407 = vmatmul.f32.vlgmr.msra.gmra.mxu1 %v370_v49 }
 0x1a5   : > { %v408_v51 = vpop.f32.mrf.mxu1 }
 0x1a6   : > { %v409_v52 = vadd.f32 %v591_v50, %v408_v51 }
 0x1a8   : > { %411 = vst [vmem:[%s303_s17] sm:$0xff] %v409_v52 }
 0x1a9   : > { %679 = shalt.err (!%p676_p8)
}
 0x1aa   : > { %531 = dma.vmem_to_hbm [thread:$0]  (%p808_p5), %s426_s18, 128, %s428_s19, %s413_s20  }
 0x1ab PF: > { %p548_p9 = scmp.ge.s32.totalorder %s722_s27, 2  ;;  %s439_s23 = sand.u32 1, %s710_s24  }
 0x1ac   : > { %s440_s14 = scalar_lea.sflag [#allocation4], %s439_s23 }
 0x1ad   : > { %p541_p10 = pnand %p548_p9, %p812_p6 }
 0x1af   : > { %p542_p11 = pneg %p541_p10 }
 0x1b1   : > { %705 = dma.done.wait (%p542_p11), %s440_s14, 128  }
 0x1b2   : > { %707 = vsyncadd (%p542_p11), %s440_s14, 4294967168  ;;  %p19_p12 = scmp.ge.s32.totalorder %s795_s30, 4   ;;  %s903_s24 = smov %s714_s25 }
 0x1b3   : > { %s904_s25 = smov %s718_s26  ;;  %s905_s26 = smov %s806_s10 }
 0x1b4   : > { %s906_s27 = smov %s795_s30  ;;  %21 = sbr.rel (!%p19_p12) target bundleno = 5 (0x5), region = 92 }
 0x1b9   :  { %446 = vsyncpa [#allocation3], 1 }
 0x1ba   :  { %448 = vsyncpa [#allocation3 + $0x1], 1 }
 0x1bb   :  { %449 = vsyncpa [#allocation6], 1 }
 0x1bc   :  { %450 = vsyncpa [#allocation4], 1 }
 0x1bd   :  { %452 = vsyncpa [#allocation4 + $0x1], 1 }

// kernel: tpu_custom_call.1
= control target key start
LH: loop header
LB: loop body
LE: loop exit
PB: predicated region body
PF: predicated region fallthrough
CT: control target
= control target key end

     0   :  { %12 = vsyncpa [#allocation3], 0  ;;  %s892_s0 = inlined_call_operand.vmem [shape: f32[16,2], index: 0, kind: input, shape index: {}]   ;;  %s893_s1 = inlined_call_operand.vmem [shape: f32[2,128], index: 1, kind: input, shape index: {}]   ;;  %s894_s2 = inlined_call_operand.vmem [shape: f32[1,128], index: 2, kind: input, shape index: {}]   ;;  %s895_s3 = inlined_call_operand.hbm [shape: f32[128,128], index: 3, kind: input, shape index: {}]   ;;  %s896_s4 = inlined_call_operand.vmem [shape: f32[1,128], index: 4, kind: input, shape index: {}]   ;;  %s897_s5 = inlined_call_operand.hbm [shape: f32[128,128], index: 5, kind: input, shape index: {}]   ;;  %s898_s6 = inlined_call_operand.vmem [shape: f32[1,128], index: 6, kind: input, shape index: {}]   ;;  %s899_s7 = inlined_call_operand.hbm [shape: f32[16,128], index: 7, kind: output, shape index: {}]  }
   0x1   :  { %13 = vsyncpa [#allocation6], 0 }
   0x2   :  { %14 = vsyncpa [#allocation4], 0 }
   0x3   :  { %16 = vsyncpa [#allocation4 + $0x1], 0  ;;  %s770_s24 = smov 0   ;;  %s772_s25 = smov 0  }
   0x4   :  { %s774_s26 = smov 0   ;;  %s776_s27 = smov 0  }
   0x5 LB: > { %s791_s28 = sadd.s32 4294967295, %s722_s27   ;;  %s509_s29 = sadd.s32 4294967294, %s722_s27   ;;  %s722_s27 = sphi %s776_s27, %s906_s27   ;;  %s718_s26 = sphi %s774_s26, %s905_s26   ;;  %s714_s25 = sphi %s772_s25, %s904_s25   ;;  %s710_s24 = sphi %s770_s24, %s903_s24  }
   0x6   : > { %s795_s30 = sadd.s32 1, %s722_s27   ;;  %s181_s8 = sadd.s32 1, %s718_s26 }
   0x7   : > { %s178_s9 = ssub.s32 %s722_s27, %s795_s30  ;;  %p191_p0 = scmp.ne.s32.totalorder %s718_s26, %s714_s25 }
   0x8   : > { %p179_p1 = scmp.eq.s32.totalorder %s178_s9, 0  ;;  %p192_p2 = scmp.eq.s32.totalorder %s791_s28, 1 }
   0x9   : > { %p197_p3 = scmp.ne.s32.totalorder %s714_s25, %s710_s24  ;;  %p198_p4 = scmp.eq.s32.totalorder %s509_s29, 1 }
   0xa   : > { %s806_s10 = scalar_select %p179_p1, %s718_s26, %s181_s8  }
   0xb   : > { %p808_p5 = por %p192_p2, %p191_p0  ;;  %p812_p6 = por %p198_p4, %p197_p3 }
   0xc   : > { %p510_p7 = scmp.ge.s32.totalorder %s722_s27, 1  ;;  %p205_p8 = scmp.lt.s32.totalorder %s722_s27, 3 }
   0xd   : > { %p544_p9 = scmp.eq.s32.totalorder %s791_s28, 0  ;;  %s222_s16 = sshll.u32 %s895_s3, 4  ;;  %s223_s16 = int_to_ptr.hbm [resolvable:$true] %s222_s16 }
   0xe   : > { %p819_p10 = pnand %p510_p7, %p205_p8  ;;  %s724_s17 = smov [#allocation2]  }
   0xf   : > { %s224_s18 = sshll.u32 %s724_s17, 4  ;;  %s239_s21 = sshll.u32 %s897_s5, 4  ;;  %s225_s18 = int_to_ptr.vmem [resolvable:$true] %s224_s18  ;;  %s240_s21 = int_to_ptr.hbm [resolvable:$true] %s239_s21 }
  0x10   : > { %p533_p11 = pneg %p819_p10  ;;  %s725_s22 = smov 128  }
  0x11   : > { %s726_s23 = smov 8   ;;  %s727_s29 = smov [#allocation5]  }
  0x12   : > { %p534_p12 = pnand %p544_p9, %p533_p11  ;;  %s241_s8 = sshll.u32 %s727_s29, 4  ;;  %s242_s8 = int_to_ptr.vmem [resolvable:$true] %s241_s8 }
  0x13   : > { %267 = sbr.rel (%p819_p10) target bundleno = 427 (0x1ab), region = 48 }
  0x14   : > { %536 = dma.hbm_to_vmem [thread:$0]  (!%p534_p12), %s223_s16, 2048, %s225_s18, [#allocation3], %s725_s22, %s725_s22, %s726_s23  }
  0x15   : > { %539 = dma.hbm_to_vmem [thread:$0]  (!%p534_p12), %s240_s21, 2048, %s242_s8, [#allocation6], %s725_s22, %s725_s22, %s726_s23  }
  0x18   : > { %697 = dma.done.wait (%p544_p9), [#allocation3], 2048  }
  0x19   : > { %699 = vsyncadd (%p544_p9), [#allocation3], 4294965248 }
  0x1a   : > { %701 = dma.done.wait (%p544_p9), [#allocation6], 2048  }
  0x1b   : > { %703 = vsyncadd (%p544_p9), [#allocation6], 4294965248  ;;  %p304_p13 = scmp.lt.s32.totalorder %s791_s28, 1  ;;  %v728_v0 = vmov 0   ;;  %v345_v2 = vld [vmem:[#allocation2 + $0x78] sm:$0xff]  ;;  %v344_v3 = vld [vmem:[#allocation2 + $0x70] sm:$0xff] }
  0x1c   : > { %587 = vset.pattern.permute.xlu0 %v728_v0  ;;  %350 = vmatpush.msra.mxu0 %v345_v2  ;;  %v343_v4 = vld [vmem:[#allocation2 + $0x68] sm:$0xff]  ;;  %v342_v5 = vld [vmem:[#allocation2 + $0x60] sm:$0xff]  ;;  %v341_v6 = vld [vmem:[#allocation2 + $0x58] sm:$0xff]  ;;  %v729_v8 = vmov 1   ;;  %s301_s23 = sand.u32 1, %s714_s25   ;;  %s520_s8 = sshll.u32 %s791_s28, 3 }
  0x1d   : > { %s305_s9 = scalar_select %p304_p13, %s791_s28, 1  ;;  %v340_v7 = vld [vmem:[#allocation2 + $0x50] sm:$0xff]  ;;  %v339_v9 = vld [vmem:[#allocation2 + $0x48] sm:$0xff]  ;;  %v338_v10 = vld [vmem:[#allocation2 + $0x40] sm:$0xff] }
  0x1e   : > { %351 = vmatpush.msra.mxu0 %v344_v3  ;;  %v337_v11 = vld [vmem:[#allocation2 + $0x38] sm:$0xff]  ;;  %v336_v12 = vld [vmem:[#allocation2 + $0x30] sm:$0xff]  ;;  %v335_v13 = vld [vmem:[#allocation2 + $0x28] sm:$0xff]  ;;  %s517_s29 = sshll.u32 %s301_s23, 3  ;;  %s423_s14 = scalar_lea.hbm %s899_s7, %s520_s8 }
  0x1f   : > { %s518_s13 = sshll.u32 %s305_s9, 3  ;;  %v334_v14 = vld [vmem:[#allocation2 + $0x20] sm:$0xff]  ;;  %v333_v15 = vld [vmem:[#allocation2 + $0x18] sm:$0xff]  ;;  %v332_v16 = vld [vmem:[#allocation2 + $0x10] sm:$0xff]  ;;  %s303_s17 = scalar_lea.vmem [#allocation7], %s517_s29 }
  0x20   : > { %s307_s16 = scalar_lea.vmem %s892_s0, %s518_s13  ;;  %352 = vmatpush.msra.mxu0 %v343_v4  ;;  %v331_v17 = vld [vmem:[#allocation2 + $0x8] sm:$0xff]  ;;  %v330_v18 = vld [vmem:[#allocation2] sm:$0xff]  ;;  %v386_v19 = vld [vmem:[#allocation5 + $0x78] sm:$0xff]  ;;  %s425_s18 = sshll.u32 %s303_s17, 4  ;;  %s426_s18 = int_to_ptr.vmem [resolvable:$true] %s425_s18 }
  0x21   : > { %v308_v1 = vld [vmem:[%s307_s16] sm:$0xff]  ;;  %v385_v20 = vld [vmem:[#allocation5 + $0x70] sm:$0xff]  ;;  %391 = vmatpush.msra.mxu1 %v386_v19  ;;  %v384_v21 = vld [vmem:[#allocation5 + $0x68] sm:$0xff]  ;;  %s427_s19 = sshll.u32 %s423_s14, 4  ;;  %s413_s20 = scalar_lea.sflag [#allocation4], %s301_s23  ;;  %s428_s19 = int_to_ptr.hbm [resolvable:$true] %s427_s19 }
  0x22   : > { %313 = vperm.xlu0 %587, %v308_v1   ;;  %353 = vmatpush.msra.mxu0 %v342_v5  ;;  %v383_v22 = vld [vmem:[#allocation5 + $0x60] sm:$0xff]  ;;  %v382_v23 = vld [vmem:[#allocation5 + $0x58] sm:$0xff]  ;;  %v381_v24 = vld [vmem:[#allocation5 + $0x50] sm:$0xff]  ;;  %s666_s21 = sshra.s32 %s428_s19, 4  ;;  %s672_s9 = scalar_lea.hbm %s899_s7, 16  ;;  %s667_s21 = int_to_ptr.hbm [resolvable:$true] %s666_s21 }
  0x23   : > { %392 = vmatpush.msra.mxu1 %v385_v20  ;;  %v380_v25 = vld [vmem:[#allocation5 + $0x48] sm:$0xff]  ;;  %v379_v26 = vld [vmem:[#allocation5 + $0x40] sm:$0xff]  ;;  %v378_v28 = vld [vmem:[#allocation5 + $0x38] sm:$0xff]  ;;  %s668_s28 = scalar_lea.hbm %s667_s21, 8  ;;  %p673_p3 = scmp.lt.s32.totalorder %s667_s21, %s899_s7 }
  0x24   : > { %354 = vmatpush.msra.mxu0 %v341_v6  ;;  %v377_v29 = vld [vmem:[#allocation5 + $0x30] sm:$0xff]  ;;  %v309_v30 = vld [vmem:[%s893_s1] sm:$0x3]  ;;  %v376_v31 = vld [vmem:[#allocation5 + $0x28] sm:$0xff]  ;;  %p669_p0 = scmp.ne.s32.totalorder %s667_s21, %s668_s28  ;;  %p674_p4 = scmp.lt.s32.totalorder %s672_s9, %s668_s28 }
  0x25   : > { %393 = vmatpush.msra.mxu1 %v384_v21  ;;  %v316_v32 = vperm.slane %v309_v30, 0  ;;  %v322_v33 = vperm.slane %v309_v30, 1  ;;  %v375_v34 = vld [vmem:[#allocation5 + $0x20] sm:$0xff]  ;;  %v374_v35 = vld [vmem:[#allocation5 + $0x18] sm:$0xff]  ;;  %v373_v43 = vld [vmem:[#allocation5 + $0x10] sm:$0xff] }
  0x26   : > { %355 = vmatpush.msra.mxu0 %v340_v7  ;;  %v589_v39 = vld [vmem:[%s894_s2] ss:$0 sm:$0xff]  ;;  %v372_v44 = vld [vmem:[#allocation5 + $0x8] sm:$0xff]  ;;  %p670_p1 = pnand %p669_p0, %p808_p5  ;;  %p675_p7 = por %p674_p4, %p673_p3 }
  0x27   : > { %394 = vmatpush.msra.mxu1 %v383_v22  ;;  %v371_v45 = vld [vmem:[#allocation5] sm:$0xff] }
  0x28   : > { %356 = vmatpush.msra.mxu0 %v339_v9  ;;  %v590_v46 = vld [vmem:[%s896_s4] ss:$0 sm:$0xff]  ;;  %p671_p2 = pneg %p670_p1 }
  0x29   : > { %395 = vmatpush.msra.mxu1 %v382_v23  ;;  %v591_v50 = vld [vmem:[%s898_s6] ss:$0 sm:$0xff] }
  0x2a   : > { %588 = vset.pattern.permute.xlu0 %v729_v8  ;;  %357 = vmatpush.msra.mxu0 %v338_v10  ;;  %p676_p8 = pnand %p675_p7, %p671_p2 }
  0x2b   : > { %319 = vperm.xlu0 %588, %v308_v1   ;;  %396 = vmatpush.msra.mxu1 %v381_v24 }
  0x2c   : > { %358 = vmatpush.msra.mxu0 %v337_v11 }
  0x2d   : > { %397 = vmatpush.msra.mxu1 %v380_v25 }
  0x2e   : > { %359 = vmatpush.msra.mxu0 %v336_v12 }
  0x2f   : > { %398 = vmatpush.msra.mxu1 %v379_v26 }
  0x30   : > { %360 = vmatpush.msra.mxu0 %v335_v13 }
  0x31   : > { %399 = vmatpush.msra.mxu1 %v378_v28 }
  0x32   : > { %361 = vmatpush.msra.mxu0 %v334_v14 }
  0x33   : > { %400 = vmatpush.msra.mxu1 %v377_v29 }
  0x34   : > { %362 = vmatpush.msra.mxu0 %v333_v15 }
  0x35   : > { %401 = vmatpush.msra.mxu1 %v376_v31 }
  0x36   : > { %363 = vmatpush.msra.mxu0 %v332_v16 }
  0x37   : > { %402 = vmatpush.msra.mxu1 %v375_v34 }
  0x38   : > { %364 = vmatpush.msra.mxu0 %v331_v17 }
  0x39   : > { %403 = vmatpush.msra.mxu1 %v374_v35 }
  0x3a   : > { %365 = vmatpush.msra.mxu0 %v330_v18 }
  0x3b   : > { %404 = vmatpush.msra.mxu1 %v373_v43 }
  0x3d   : > { %405 = vmatpush.msra.mxu1 %v372_v44 }
  0x3f   : > { %406 = vmatpush.msra.mxu1 %v371_v45 }
  0x94   : > { %v314_v27 = vpop.permute.xlu0 %313 }
  0x95   : > { %v317_v37 = vmul.f32 %v316_v32, %v314_v27 }
  0x9d   : > { %v320_v36 = vpop.permute.xlu0 %319 }
  0x9e   : > { %v323_v38 = vmul.f32 %v322_v33, %v320_v36 }
  0xa0   : > { %v324_v40 = vadd.f32 %v323_v38, %v317_v37 }
  0xa2   : > { %v328_v41 = vadd.f32 %v589_v39, %v324_v40 }
  0xa4   : > { %v329_v42 = vmax.f32 %v328_v41, 0.0 }
  0xa6   : > { %366 = vmatmul.f32.vlgmr.msra.gmra.mxu0 %v329_v42 }
 0x123   : > { %v367_v47 = vpop.f32.mrf.mxu0 }
 0x124   : > { %v368_v48 = vadd.f32 %v590_v46, %v367_v47 }
 0x126   : > { %v370_v49 = vmax.f32 %v368_v48, 0.0 }
 0x128   : > { %407 = vmatmul.f32.vlgmr.msra.gmra.mxu1 %v370_v49 }
 0x1a5   : > { %v408_v51 = vpop.f32.mrf.mxu1 }
 0x1a6   : > { %v409_v52 = vadd.f32 %v591_v50, %v408_v51 }
 0x1a8   : > { %411 = vst [vmem:[%s303_s17] sm:$0xff] %v409_v52 }
 0x1a9   : > { %679 = shalt.err (!%p676_p8)
}
 0x1aa   : > { %531 = dma.vmem_to_hbm [thread:$0]  (%p808_p5), %s426_s18, 128, %s428_s19, %s413_s20  }
 0x1ab PF: > { %p548_p9 = scmp.ge.s32.totalorder %s722_s27, 2  ;;  %s439_s23 = sand.u32 1, %s710_s24  }
 0x1ac   : > { %s440_s14 = scalar_lea.sflag [#allocation4], %s439_s23 }
 0x1ad   : > { %p541_p10 = pnand %p548_p9, %p812_p6 }
 0x1af   : > { %p542_p11 = pneg %p541_p10 }
 0x1b1   : > { %705 = dma.done.wait (%p542_p11), %s440_s14, 128  }
 0x1b2   : > { %707 = vsyncadd (%p542_p11), %s440_s14, 4294967168  ;;  %p19_p12 = scmp.ge.s32.totalorder %s795_s30, 4   ;;  %s903_s24 = smov %s714_s25 }
 0x1b3   : > { %s904_s25 = smov %s718_s26  ;;  %s905_s26 = smov %s806_s10 }
 0x1b4   : > { %s906_s27 = smov %s795_s30  ;;  %21 = sbr.rel (!%p19_p12) target bundleno = 5 (0x5), region = 92 }
 0x1b9   :  { %446 = vsyncpa [#allocation3], 1 }
 0x1ba   :  { %448 = vsyncpa [#allocation3 + $0x1], 1 }
 0x1bb   :  { %449 = vsyncpa [#allocation6], 1 }
 0x1bc   :  { %450 = vsyncpa [#allocation4], 1 }
 0x1bd   :  { %452 = vsyncpa [#allocation4 + $0x1], 1 }

</bundles_post_ra>
